<compile_context>
chip_gen: v7x
topology: tpu7x:2x2x1
jax: 0.10.0
libtpu: 0.0.40
codegen_flags: <defaults>
</compile_context>

<pallas_src>
import jax
import jax.numpy as jnp
from jax.experimental import pallas as pl
from jax.experimental.pallas import tpu as pltpu

# Resident bytes per batch-slab per grid step: 2x(in + gy + gx) double-buffered
# (= 6 slabs) plus ~4 slabs of slack for compiler temporaries / relayouts.
_RESIDENT_SLABS = 10


def _cdiv(a, b):
    return -(-a // b)


def _tpu_topology():
    """Returns (physical VMEM bytes per core, TensorCores per device)."""
    vmem_cap = 64 * 1024 * 1024  # conservative default = v7x per-TC VMEM
    num_cores = 1
    try:
        info = pltpu.get_tpu_info()
        cap = int(getattr(info, "vmem_capacity_bytes", 0) or 0)
        if cap > 0:
            vmem_cap = cap
        for name in ("num_cores", "core_count", "num_tensorcores",
                     "tensorcores_per_chip", "cores_per_chip"):
            val = getattr(info, name, None)
            if val:
                num_cores = int(val)
                break
    except Exception:
        pass
    if num_cores <= 1:
        try:
            if "v7" in jax.devices()[0].device_kind.lower():
                num_cores = 2
        except Exception:
            pass
    return vmem_cap, max(1, min(num_cores, 2))


def _default_budget(vmem_cap):
    # Working-set budget: half of physical VMEM, capped at 48 MiB.
    # v5e/v6e (128 MiB) -> 48 MiB; v7x (64 MiB) -> 32 MiB.
    return max(8 << 20, min(vmem_cap // 2, 48 << 20))


def _vmem_limit_bytes(resident_bytes, vmem_cap):
    limit = int(resident_bytes) + max(int(resident_bytes) // 2, 16 << 20)
    limit = max(limit, 32 << 20)
    return int(min(limit, (int(vmem_cap) * 7) // 8))


def _pick_batch_tile(B, slab_bytes, budget_bytes, num_cores):
    """Largest batch tile fitting the budget; on multi-core chips prefer a tile
    whose (cdiv) grid length is a multiple of the core count."""
    max_tb = max(1, int(budget_bytes) // int(_RESIDENT_SLABS * slab_bytes))
    max_tb = min(max_tb, B)
    if num_cores <= 1 or B < num_cores:
        return max_tb
    cap = max(1, min(max_tb, _cdiv(B, num_cores)))
    for tb in range(cap, max(0, cap - 64), -1):
        if _cdiv(B, tb) % num_cores == 0:
            return tb
    return cap  # best effort; slight tail imbalance is acceptable


def _spatial_tile(budget_units, full, align):
    if budget_units >= full:
        return full
    t = (budget_units // align) * align
    if t <= 0:
        t = align
    return min(t, full)


# ----------------------------- kernels --------------------------------------


def _tv_kernel(a_ref, gy_ref, gx_ref):
    # One block read; diffs on value slices (stores define the trimmed shapes).
    a = a_ref[...]
    H, W = a.shape[1], a.shape[2]
    gy_ref[...] = jnp.abs(a[:, : H - 1, :] - a[:, 1:, :])
    gx_ref[...] = jnp.abs(a[:, :, : W - 1] - a[:, :, 1:])


def _tv_gy_kernel(a_ref, gy_ref):
    a = a_ref[...]
    H = a.shape[1]
    gy_ref[...] = jnp.abs(a[:, : H - 1, :] - a[:, 1:, :])


def _tv_gx_kernel(a_ref, gx_ref):
    a = a_ref[...]
    W = a.shape[2]
    gx_ref[...] = jnp.abs(a[:, :, : W - 1] - a[:, :, 1:])


def _tv_sum_kernel(a_ref, sy_ref, sx_ref):
    @pl.when(pl.program_id(0) == 0)
    def _init():
        sy_ref[...] = jnp.zeros_like(sy_ref)
        sx_ref[...] = jnp.zeros_like(sx_ref)

    a = a_ref[...].astype(jnp.float32)
    H, W = a.shape[1], a.shape[2]
    sy_ref[...] += jnp.sum(jnp.abs(a[:, : H - 1, :] - a[:, 1:, :]))
    sx_ref[...] += jnp.sum(jnp.abs(a[:, :, : W - 1] - a[:, :, 1:]))


# ----------------------------- pallas calls ---------------------------------


def _tv_full_slab_call(a_flat, B, H, W, itemsize, budget, num_cores, vmem_cap):
    slab_bytes = H * W * itemsize
    tb = _pick_batch_tile(B, slab_bytes, budget, num_cores)
    resident = _RESIDENT_SLABS * tb * slab_bytes
    cost = pl.CostEstimate(
        flops=int(4 * B * H * W),
        transcendentals=0,
        bytes_accessed=int((B * H * W + B * (H - 1) * W + B * H * (W - 1)) * itemsize),
    )
    return pl.pallas_call(
        _tv_kernel,
        out_shape=(
            jax.ShapeDtypeStruct((B, H - 1, W), a_flat.dtype),
            jax.ShapeDtypeStruct((B, H, W - 1), a_flat.dtype),
        ),
        grid_spec=pltpu.PrefetchScalarGridSpec(
            num_scalar_prefetch=0,
            grid=(_cdiv(B, tb),),
            in_specs=[pl.BlockSpec((tb, H, W), lambda b: (b, 0, 0))],
            out_specs=(
                pl.BlockSpec((tb, H - 1, W), lambda b: (b, 0, 0)),
                pl.BlockSpec((tb, H, W - 1), lambda b: (b, 0, 0)),
            ),
        ),
        compiler_params=pltpu.CompilerParams(
            dimension_semantics=("parallel",),
            vmem_limit_bytes=_vmem_limit_bytes(resident, vmem_cap),
        ),
        cost_estimate=cost,
    )(a_flat)


def _tv_gy_spatial_call(a_flat, B, H, W, itemsize, budget, vmem_cap):
    # Diff along H needs the whole H extent per block -> tile along W (no halo).
    # TODO(synk): add an H-halo tiled pass for the pathological case where a
    # full-H column block (H x 128) still exceeds VMEM.
    col_budget = max(1, budget // (_RESIDENT_SLABS * H * itemsize))
    tw = _spatial_tile(col_budget, W, 128)
    tb = min(B, max(1, budget // (_RESIDENT_SLABS * H * tw * itemsize)))
    resident = _RESIDENT_SLABS * tb * H * tw * itemsize
    cost = pl.CostEstimate(
        flops=int(2 * B * (H - 1) * W),
        transcendentals=0,
        bytes_accessed=int((B * H * W + B * (H - 1) * W) * itemsize),
    )
    return pl.pallas_call(
        _tv_gy_kernel,
        out_shape=jax.ShapeDtypeStruct((B, H - 1, W), a_flat.dtype),
        grid_spec=pltpu.PrefetchScalarGridSpec(
            num_scalar_prefetch=0,
            grid=(_cdiv(B, tb), _cdiv(W, tw)),
            in_specs=[pl.BlockSpec((tb, H, tw), lambda b, w: (b, 0, w))],
            out_specs=pl.BlockSpec((tb, H - 1, tw), lambda b, w: (b, 0, w)),
        ),
        compiler_params=pltpu.CompilerParams(
            dimension_semantics=("parallel", "parallel"),
            vmem_limit_bytes=_vmem_limit_bytes(resident, vmem_cap),
        ),
        cost_estimate=cost,
    )(a_flat)


def _tv_gx_spatial_call(a_flat, B, H, W, itemsize, budget, vmem_cap):
    # Diff along W needs the whole W extent per block -> tile along H (no halo).
    row_budget = max(1, budget // (_RESIDENT_SLABS * W * itemsize))
    th = _spatial_tile(row_budget, H, 8)
    tb = min(B, max(1, budget // (_RESIDENT_SLABS * th * W * itemsize)))
    resident = _RESIDENT_SLABS * tb * th * W * itemsize
    cost = pl.CostEstimate(
        flops=int(2 * B * H * (W - 1)),
        transcendentals=0,
        bytes_accessed=int((B * H * W + B * H * (W - 1)) * itemsize),
    )
    return pl.pallas_call(
        _tv_gx_kernel,
        out_shape=jax.ShapeDtypeStruct((B, H, W - 1), a_flat.dtype),
        grid_spec=pltpu.PrefetchScalarGridSpec(
            num_scalar_prefetch=0,
            grid=(_cdiv(B, tb), _cdiv(H, th)),
            in_specs=[pl.BlockSpec((tb, th, W), lambda b, h: (b, h, 0))],
            out_specs=pl.BlockSpec((tb, th, W - 1), lambda b, h: (b, h, 0)),
        ),
        compiler_params=pltpu.CompilerParams(
            dimension_semantics=("parallel", "parallel"),
            vmem_limit_bytes=_vmem_limit_bytes(resident, vmem_cap),
        ),
        cost_estimate=cost,
    )(a_flat)


# ----------------------------- public API -----------------------------------


def tv_loss(a, *, vmem_budget_bytes=None, force_spatial_tiling=False):
    """a: (N, C, D, H, W) -> (gradient_a_y, gradient_a_x), like TV_Loss.forward."""
    N, C, D, H, W = a.shape
    B = N * C * D
    a_flat = a.reshape(B, H, W)
    itemsize = jnp.dtype(a.dtype).itemsize
    slab_bytes = H * W * itemsize

    vmem_cap, num_cores = _tpu_topology()
    budget = int(vmem_budget_bytes) if vmem_budget_bytes else _default_budget(vmem_cap)

    fits_full_slab = _RESIDENT_SLABS * slab_bytes <= budget
    if fits_full_slab and not force_spatial_tiling:
        gy_flat, gx_flat = _tv_full_slab_call(
            a_flat, B, H, W, itemsize, budget, num_cores, vmem_cap)
    else:
        # Huge-slab fallback: two spatially tiled passes (costs one extra input
        # read, but stays within VMEM on every generation, including v7x).
        gy_flat = _tv_gy_spatial_call(a_flat, B, H, W, itemsize, budget, vmem_cap)
        gx_flat = _tv_gx_spatial_call(a_flat, B, H, W, itemsize, budget, vmem_cap)

    return (gy_flat.reshape(N, C, D, H - 1, W),
            gx_flat.reshape(N, C, D, H, W - 1))


def _largest_divisor_leq(n, cap):
    cap = max(1, min(cap, n))
    for d in range(cap, 0, -1):
        if n % d == 0:
            return d
    return 1


def tv_loss_sums(a, *, vmem_budget_bytes=None):
    """Fused variant: returns (sum|grad_y|, sum|grad_x|) as float32 scalars.

    For callers that immediately reduce the TV gradients this cuts HBM traffic
    ~3x vs tv_loss() (read input once, write nothing but two scalars).
    """
    N, C, D, H, W = a.shape
    B = N * C * D
    a_flat = a.reshape(B, H, W)
    itemsize = jnp.dtype(a.dtype).itemsize
    slab_bytes = H * W * itemsize

    vmem_cap, _ = _tpu_topology()
    budget = int(vmem_budget_bytes) if vmem_budget_bytes else _default_budget(vmem_cap)

    # Read-only streaming: ~6 resident slabs (double-buffered input + temps).
    max_tb = max(1, budget // (6 * slab_bytes))
    # Divisor tile so padded (garbage) slabs never pollute the accumulated sums.
    tb = _largest_divisor_leq(B, max_tb)
    # TODO(synk): spatially tile this fused variant too for slabs > VMEM budget.
    resident = 6 * tb * slab_bytes
    cost = pl.CostEstimate(
        flops=int(6 * B * H * W),
        transcendentals=0,
        bytes_accessed=int(B * H * W * itemsize),
    )
    sy, sx = pl.pallas_call(
        _tv_sum_kernel,
        out_shape=(
            jax.ShapeDtypeStruct((1, 1), jnp.float32),
            jax.ShapeDtypeStruct((1, 1), jnp.float32),
        ),
        grid_spec=pltpu.PrefetchScalarGridSpec(
            num_scalar_prefetch=0,
            grid=(B // tb,),
            in_specs=[pl.BlockSpec((tb, H, W), lambda b: (b, 0, 0))],
            out_specs=(
                pl.BlockSpec((1, 1), lambda b: (0, 0)),
                pl.BlockSpec((1, 1), lambda b: (0, 0)),
            ),
        ),
        compiler_params=pltpu.CompilerParams(
            dimension_semantics=("arbitrary",),
            vmem_limit_bytes=_vmem_limit_bytes(resident, vmem_cap),
        ),
        cost_estimate=cost,
    )(a_flat)
    return sy.reshape(()), sx.reshape(())


if __name__ == "__main__":
    key = jax.random.PRNGKey(0)
    # Small 5-D input consistent with the module's indexing: (N, C, D, H, W)
    N, C, D, H, W = 2, 4, 3, 16, 16
    a = jax.random.normal(key, (N, C, D, H, W), dtype=jnp.float32)

    # Plain-JAX reference.
    gy_ref = jnp.abs(a[:, :, :, :-1, :] - a[:, :, :, 1:, :])
    gx_ref = jnp.abs(a[:, :, :, :, :-1] - a[:, :, :, :, 1:])

    # Main batched full-slab path.
    gy, gx = tv_loss(a)
    jax.block_until_ready((gy, gx))
    assert gy.shape == (N, C, D, H - 1, W)
    assert gx.shape == (N, C, D, H, W - 1)
    assert jnp.allclose(gy, gy_ref, atol=1e-6)
    assert jnp.allclose(gx, gx_ref, atol=1e-6)

    # Spatially tiled fallback (auto-selected for huge slabs); force it here
    # with a tiny budget so that path is exercised and verified too.
    gy2, gx2 = tv_loss(a, vmem_budget_bytes=8 * 1024, force_spatial_tiling=True)
    jax.block_until_ready((gy2, gx2))
    assert jnp.allclose(gy2, gy_ref, atol=1e-6)
    assert jnp.allclose(gx2, gx_ref, atol=1e-6)

    # Fused-reduction variant.
    sy, sx = tv_loss_sums(a)
    jax.block_until_ready((sy, sx))
    assert jnp.allclose(sy, jnp.sum(gy_ref), rtol=1e-4, atol=1e-3)
    assert jnp.allclose(sx, jnp.sum(gx_ref), rtol=1e-4, atol=1e-3)

    print("KERNEL_OK")
</pallas_src>

<mosaic_0001>
module attributes {stable_mosaic.version = 11 : i64} {
  func.func @_tv_kernel(%arg0: i32, %arg1: memref<24x16x16xf32, #tpu.memory_space<vmem>>, %arg2: memref<24x15x16xf32, #tpu.memory_space<vmem>>, %arg3: memref<24x16x15xf32, #tpu.memory_space<vmem>>) attributes {dimension_semantics = [#tpu.dimension_semantics<parallel>], iteration_bounds = array<i64: 1>, scalar_prefetch = 0 : i64, scratch_operands = 0 : i64, tpu.core_type = #tpu.core_type<tc>, window_params = [{transform_indices = @transform_0, window_bounds = array<i64: 24, 16, 16>}, {transform_indices = @transform_1, window_bounds = array<i64: 24, 15, 16>}, {transform_indices = @transform_2, window_bounds = array<i64: 24, 16, 15>}]} {
    %c0 = arith.constant 0 : index
    %c0_0 = arith.constant 0 : index
    %c0_1 = arith.constant 0 : index
    %0 = vector.load %arg1[%c0, %c0_0, %c0_1] : memref<24x16x16xf32, #tpu.memory_space<vmem>>, vector<24x16x16xf32>
    %1 = vector.extract_strided_slice %0 {offsets = [0, 0, 0], sizes = [24, 15, 16], strides = [1, 1, 1]} : vector<24x16x16xf32> to vector<24x15x16xf32>
    %2 = vector.extract_strided_slice %0 {offsets = [0, 1, 0], sizes = [24, 15, 16], strides = [1, 1, 1]} : vector<24x16x16xf32> to vector<24x15x16xf32>
    %3 = arith.subf %1, %2 : vector<24x15x16xf32>
    %4 = math.absf %3 : vector<24x15x16xf32>
    %c0_2 = arith.constant 0 : index
    %c0_3 = arith.constant 0 : index
    %c0_4 = arith.constant 0 : index
    %5 = vector.load %arg2[%c0_2, %c0_3, %c0_4] : memref<24x15x16xf32, #tpu.memory_space<vmem>>, vector<24x15x16xf32>
    tpu.vector_store %arg2[%c0_2, %c0_3, %c0_4], %4 {strides = array<i32>} : memref<24x15x16xf32, #tpu.memory_space<vmem>>, vector<24x15x16xf32>,
    %6 = vector.extract_strided_slice %0 {offsets = [0, 0, 0], sizes = [24, 16, 15], strides = [1, 1, 1]} : vector<24x16x16xf32> to vector<24x16x15xf32>
    %7 = vector.extract_strided_slice %0 {offsets = [0, 0, 1], sizes = [24, 16, 15], strides = [1, 1, 1]} : vector<24x16x16xf32> to vector<24x16x15xf32>
    %8 = arith.subf %6, %7 : vector<24x16x15xf32>
    %9 = math.absf %8 : vector<24x16x15xf32>
    %c0_5 = arith.constant 0 : index
    %c0_6 = arith.constant 0 : index
    %c0_7 = arith.constant 0 : index
    %10 = vector.load %arg3[%c0_5, %c0_6, %c0_7] : memref<24x16x15xf32, #tpu.memory_space<vmem>>, vector<24x16x15xf32>
    tpu.vector_store %arg3[%c0_5, %c0_6, %c0_7], %9 {strides = array<i32>} : memref<24x16x15xf32, #tpu.memory_space<vmem>>, vector<24x16x15xf32>,
    return
  }
  func.func @transform_0(%arg0: i32) -> (i32, i32, i32) {
    %c0_i32 = arith.constant 0 : i32
    %c0_i32_0 = arith.constant 0 : i32
    %c0_i32_1 = arith.constant 0 : i32
    return %arg0, %c0_i32, %c0_i32_0 : i32, i32, i32
  }
  func.func @transform_1(%arg0: i32) -> (i32, i32, i32) {
    %c0_i32 = arith.constant 0 : i32
    %c0_i32_0 = arith.constant 0 : i32
    %c0_i32_1 = arith.constant 0 : i32
    return %arg0, %c0_i32, %c0_i32_0 : i32, i32, i32
  }
  func.func @transform_2(%arg0: i32) -> (i32, i32, i32) {
    %c0_i32 = arith.constant 0 : i32
    %c0_i32_0 = arith.constant 0 : i32
    %c0_i32_1 = arith.constant 0 : i32
    return %arg0, %c0_i32, %c0_i32_0 : i32, i32, i32
  }
}

</mosaic_0001>

<bundles_post_ra>
// kernel: tpu_custom_call.1
= control target key start
LH: loop header
LB: loop body
LE: loop exit
PB: predicated region body
PF: predicated region fallthrough
CT: control target
= control target key end

     0   :  { %vm106_vm0 = vcmask 1046528   ;;  %s671_s15 = smov 127   ;;  %vm323_vm1 = vcmask 130048   ;;  %vm325_vm2 = vcmask 129024   ;;  %vm613_vm3 = vcmask 121856   ;;  %s1575_s0 = inlined_call_operand.vmem [shape: f32[24,16,16], index: 0, kind: input, shape index: {}]   ;;  %s1576_s1 = inlined_call_operand.vmem [shape: f32[24,15,16], index: 1, kind: output, shape index: {0}]   ;;  %s1577_s2 = inlined_call_operand.vmem [shape: f32[24,16,15], index: 2, kind: output, shape index: {1}]  }
   0x1   :  { %v690_v0 = vld [vmem:[%s1575_s0 + $0x10] sm:$0xff]  ;;  %v695_v1 = vld [vmem:[%s1575_s0] sm:$0xff]  ;;  %v700_v2 = vld [vmem:[%s1575_s0 + $0x18] sm:$0xff] }
   0x2   :  { %377 = vrot.lane.b32.xlu1 %v690_v0, %s671_s15  ;;  %v110_v3 = vrot.slane %v690_v0, 1  ;;  %373 = vrot.lane.b32.xlu0 %v695_v1, %s671_s15  ;;  %v107_v4 = vrot.slane %v695_v1, 1  ;;  %v111_v5 = vrot.slane %v700_v2, 1  ;;  %v712_v6 = vld [vmem:[%s1575_s0 + $0x8] sm:$0xff]  ;;  %v724_v10 = vld [vmem:[%s1575_s0 + $0x20] sm:$0xff] }
   0x3   :  { %v717_v7 = vld [vmem:[%s1575_s0 + $0x28] sm:$0xff]  ;;  %v108_v8 = vrot.slane %v712_v6, 1  ;;  %v729_v11 = vld [vmem:[%s1575_s0 + $0x38] sm:$0xff]  ;;  %v113_v14 = vrot.slane %v724_v10, 1  ;;  %v742_v20 = vld [vmem:[%s1575_s0 + $0x30] sm:$0xff] }
   0x4   :  { %v114_v9 = vrot.slane %v717_v7, 1  ;;  %v230_v12 = vsub.f32 %v700_v2, %v111_v5  ;;  %v112_v13 = vsel %vm106_vm0, %v110_v3, %v111_v5  ;;  %v117_v15 = vrot.slane %v729_v11, 1  ;;  %v747_v21 = vld [vmem:[%s1575_s0 + $0x48] sm:$0xff]  ;;  %v759_v26 = vld [vmem:[%s1575_s0 + $0x40] sm:$0xff]  ;;  %v764_v27 = vld [vmem:[%s1575_s0 + $0x58] sm:$0xff] }
   0x5   :  { %v229_v16 = vsub.f32 %v690_v0, %v112_v13  ;;  %v228_v17 = vsub.f32 %v712_v6, %v108_v8  ;;  %v109_v18 = vsel %vm106_vm0, %v107_v4, %v108_v8  ;;  %v769_v28 = vld [vmem:[%s1575_s0 + $0x50] sm:$0xff]  ;;  %v775_v33 = vld [vmem:[%s1575_s0 + $0x68] sm:$0xff]  ;;  %v116_v36 = vrot.slane %v742_v20, 1  ;;  %v801_v42 = vld [vmem:[%s1575_s0 + $0x60] sm:$0xff] }
   0x6   :  { %v232_v19 = vsub.f32 %v717_v7, %v114_v9  ;;  %v278_v22 = vand.u32 2147483647, %v230_v12  ;;  %379 = vrot.lane.b32.xlu1 %v700_v2, %s671_s15  ;;  %375 = vrot.lane.b32.xlu0 %v712_v6, %s671_s15  ;;  %v227_v23 = vsub.f32 %v695_v1, %v109_v18  ;;  %v115_v24 = vsel %vm106_vm0, %v113_v14, %v114_v9  ;;  %v833_v55 = vld [vmem:[%s1575_s0 + $0x78] sm:$0xff]  ;;  %v838_v56 = vld [vmem:[%s1575_s0 + $0x70] sm:$0xff] }
   0x7   :  { %v234_v25 = vsub.f32 %v729_v11, %v117_v15  ;;  %v277_v29 = vand.u32 2147483647, %v229_v16  ;;  %v276_v30 = vand.u32 2147483647, %v228_v17  ;;  %v231_v32 = vsub.f32 %v724_v10, %v115_v24  ;;  %v843_v57 = vld [vmem:[%s1575_s0 + $0x88] sm:$0xff]  ;;  %v850_v62 = vld [vmem:[%s1575_s0 + $0x80] sm:$0xff] }
   0x8   :  { %v280_v31 = vand.u32 2147483647, %v232_v19  ;;  %328 = vst.msk [vmem:[%s1576_s1 + $0x18] sm:$0x7f] %vm325_vm2, %v278_v22  ;;  %v275_v34 = vand.u32 2147483647, %v227_v23  ;;  %v118_v43 = vsel %vm106_vm0, %v116_v36, %v117_v15 }
   0x9   :  { %v282_v35 = vand.u32 2147483647, %v234_v25  ;;  %v120_v37 = vrot.slane %v747_v21, 1  ;;  %327 = vst.msk [vmem:[%s1576_s1 + $0x10] sm:$0xff] %vm323_vm1, %v277_v29  ;;  %v279_v38 = vand.u32 2147483647, %v231_v32  ;;  %v233_v47 = vsub.f32 %v742_v20, %v118_v43 }
   0xa   :  { %326 = vst.msk [vmem:[%s1576_s1 + $0x8] sm:$0x7f] %vm325_vm2, %v276_v30  ;;  %330 = vst.msk [vmem:[%s1576_s1 + $0x28] sm:$0x7f] %vm325_vm2, %v280_v31  ;;  %v119_v39 = vrot.slane %v759_v26, 1  ;;  %v123_v40 = vrot.slane %v764_v27, 1  ;;  %383 = vrot.lane.b32.xlu1 %v717_v7, %s671_s15  ;;  %381 = vrot.lane.b32.xlu0 %v724_v10, %s671_s15 }
   0xb   :  { %v122_v41 = vrot.slane %v769_v28, 1  ;;  %324 = vst.msk [vmem:[%s1576_s1] sm:$0xff] %vm323_vm1, %v275_v34  ;;  %v236_v44 = vsub.f32 %v747_v21, %v120_v37  ;;  %v126_v45 = vrot.slane %v775_v33, 1  ;;  %v125_v46 = vrot.slane %v801_v42, 1  ;;  %329 = vst.msk [vmem:[%s1576_s1 + $0x20] sm:$0xff] %vm323_vm1, %v279_v38  ;;  %v876_v14 = vld [vmem:[%s1575_s0 + $0x98] sm:$0xff] }
   0xc   :  { %332 = vst.msk [vmem:[%s1576_s1 + $0x38] sm:$0x7f] %vm325_vm2, %v282_v35  ;;  %v121_v48 = vsel %vm106_vm0, %v119_v39, %v120_v37  ;;  %v238_v49 = vsub.f32 %v764_v27, %v123_v40  ;;  %v281_v58 = vand.u32 2147483647, %v233_v47  ;;  %v129_v61 = vrot.slane %v833_v55, 1  ;;  %v881_v15 = vld [vmem:[%s1575_s0 + $0x90] sm:$0xff] }
   0xd   :  { %v124_v50 = vsel %vm106_vm0, %v122_v41, %v123_v40  ;;  %v284_v51 = vand.u32 2147483647, %v236_v44  ;;  %v235_v52 = vsub.f32 %v759_v26, %v121_v48  ;;  %v240_v54 = vsub.f32 %v775_v33, %v126_v45  ;;  %v886_v16 = vld [vmem:[%s1575_s0 + $0xa8] sm:$0xff]  ;;  %v909_v30 = vld [vmem:[%s1575_s0 + $0xa0] sm:$0xff]  ;;  %v926_v36 = vld [vmem:[%s1575_s0 + $0xb8] sm:$0xff] }
   0xe   :  { %v237_v53 = vsub.f32 %v769_v28, %v124_v50  ;;  %v286_v59 = vand.u32 2147483647, %v238_v49  ;;  %v127_v60 = vsel %vm106_vm0, %v125_v46, %v126_v45  ;;  %387 = vrot.lane.b32.xlu1 %v729_v11, %s671_s15  ;;  %385 = vrot.lane.b32.xlu0 %v742_v20, %s671_s15  ;;  %331 = vst.msk [vmem:[%s1576_s1 + $0x30] sm:$0xff] %vm323_vm1, %v281_v58  ;;  %v128_v9 = vrot.slane %v838_v56, 1  ;;  %v938_v41 = vld [vmem:[%s1575_s0 + $0xb0] sm:$0xff] }
   0xf   :  { %334 = vst.msk [vmem:[%s1576_s1 + $0x48] sm:$0x7f] %vm325_vm2, %v284_v51  ;;  %v283_v63 = vand.u32 2147483647, %v235_v52  ;;  %v288_v4 = vand.u32 2147483647, %v240_v54  ;;  %v239_v5 = vsub.f32 %v801_v42, %v127_v60  ;;  %v242_v8 = vsub.f32 %v833_v55, %v129_v61 }
  0x10   :  { %v285_v3 = vand.u32 2147483647, %v237_v53  ;;  %336 = vst.msk [vmem:[%s1576_s1 + $0x58] sm:$0x7f] %vm325_vm2, %v286_v59  ;;  %v132_v12 = vrot.slane %v843_v57, 1  ;;  %v131_v13 = vrot.slane %v850_v62, 1  ;;  %v130_v24 = vsel %vm106_vm0, %v128_v9, %v129_v61 }
  0x11   :  { %333 = vst.msk [vmem:[%s1576_s1 + $0x40] sm:$0xff] %vm323_vm1, %v283_v63  ;;  %v287_v17 = vand.u32 2147483647, %v239_v5  ;;  %v135_v18 = vrot.slane %v876_v14, 1  ;;  %v134_v19 = vrot.slane %v881_v15, 1  ;;  %v138_v22 = vrot.slane %v886_v16, 1 }
  0x12   :  { %335 = vst.msk [vmem:[%s1576_s1 + $0x50] sm:$0xff] %vm323_vm1, %v285_v3  ;;  %v290_v23 = vand.u32 2147483647, %v242_v8  ;;  %v244_v25 = vsub.f32 %v843_v57, %v132_v12  ;;  %v133_v29 = vsel %vm106_vm0, %v131_v13, %v132_v12  ;;  %391 = vrot.lane.b32.xlu1 %v747_v21, %s671_s15  ;;  %389 = vrot.lane.b32.xlu0 %v759_v26, %s671_s15  ;;  %v137_v35 = vrot.slane %v909_v30, 1  ;;  %v951_v51 = vld [vmem:[%s1575_s0 + $0xc8] sm:$0xff] }
  0x13   :  { %338 = vst.msk [vmem:[%s1576_s1 + $0x68] sm:$0x7f] %vm325_vm2, %v288_v4  ;;  %v241_v31 = vsub.f32 %v838_v56, %v130_v24  ;;  %v243_v32 = vsub.f32 %v850_v62, %v133_v29  ;;  %v246_v34 = vsub.f32 %v876_v14, %v135_v18  ;;  %v136_v38 = vsel %vm106_vm0, %v134_v19, %v135_v18  ;;  %v956_v52 = vld [vmem:[%s1575_s0 + $0xc0] sm:$0xff]  ;;  %v980_v60 = vld [vmem:[%s1575_s0 + $0xd8] sm:$0xff]  ;;  %v985_v61 = vld [vmem:[%s1575_s0 + $0xd0] sm:$0xff] }
  0x14   :  { %337 = vst.msk [vmem:[%s1576_s1 + $0x60] sm:$0xff] %vm323_vm1, %v287_v17  ;;  %v292_v37 = vand.u32 2147483647, %v244_v25  ;;  %v248_v39 = vsub.f32 %v886_v16, %v138_v22  ;;  %v141_v40 = vrot.slane %v926_v36, 1  ;;  %v245_v46 = vsub.f32 %v881_v15, %v136_v38  ;;  %v1004_v17 = vld [vmem:[%s1575_s0 + $0xe8] sm:$0xff]  ;;  %v1017_v24 = vld [vmem:[%s1575_s0 + $0xe0] sm:$0xff] }
  0x15   :  { %340 = vst.msk [vmem:[%s1576_s1 + $0x78] sm:$0x7f] %vm325_vm2, %v290_v23  ;;  %v289_v43 = vand.u32 2147483647, %v241_v31  ;;  %v291_v44 = vand.u32 2147483647, %v243_v32  ;;  %v139_v48 = vsel %vm106_vm0, %v137_v35, %v138_v22 }
  0x16   :  { %v294_v45 = vand.u32 2147483647, %v246_v34  ;;  %342 = vst.msk [vmem:[%s1576_s1 + $0x88] sm:$0x7f] %vm325_vm2, %v292_v37  ;;  %v296_v47 = vand.u32 2147483647, %v248_v39  ;;  %v250_v49 = vsub.f32 %v926_v36, %v141_v40  ;;  %395 = vrot.lane.b32.xlu1 %v764_v27, %s671_s15  ;;  %393 = vrot.lane.b32.xlu0 %v769_v28, %s671_s15  ;;  %v247_v54 = vsub.f32 %v909_v30, %v139_v48 }
  0x17   :  { %v140_v50 = vrot.slane %v938_v41, 1  ;;  %339 = vst.msk [vmem:[%s1576_s1 + $0x70] sm:$0xff] %vm323_vm1, %v289_v43  ;;  %341 = vst.msk [vmem:[%s1576_s1 + $0x80] sm:$0xff] %vm323_vm1, %v291_v44  ;;  %v293_v53 = vand.u32 2147483647, %v245_v46  ;;  %v144_v58 = vrot.slane %v951_v51, 1 }
  0x18   :  { %344 = vst.msk [vmem:[%s1576_s1 + $0x98] sm:$0x7f] %vm325_vm2, %v294_v45  ;;  %v143_v59 = vrot.slane %v956_v52, 1  ;;  %346 = vst.msk [vmem:[%s1576_s1 + $0xa8] sm:$0x7f] %vm325_vm2, %v296_v47  ;;  %v147_v4 = vrot.slane %v980_v60, 1 }
  0x19   :  { %v298_v63 = vand.u32 2147483647, %v250_v49  ;;  %v142_v3 = vsel %vm106_vm0, %v140_v50, %v141_v40  ;;  %v146_v5 = vrot.slane %v985_v61, 1  ;;  %343 = vst.msk [vmem:[%s1576_s1 + $0x90] sm:$0xff] %vm323_vm1, %v293_v53  ;;  %v295_v8 = vand.u32 2147483647, %v247_v54 }
  0x1a   :  { %v249_v9 = vsub.f32 %v938_v41, %v142_v3  ;;  %v252_v12 = vsub.f32 %v951_v51, %v144_v58  ;;  %v145_v13 = vsel %vm106_vm0, %v143_v59, %v144_v58  ;;  %v254_v19 = vsub.f32 %v980_v60, %v147_v4  ;;  %v1022_v25 = vld [vmem:[%s1575_s0 + $0xf8] sm:$0xff]  ;;  %399 = vrot.lane.b32.xlu1 %v775_v33, %s671_s15  ;;  %v1037_v35 = vld [vmem:[%s1575_s0 + $0xf0] sm:$0xff]  ;;  %v1044_v43 = vld [vmem:[%s1575_s0 + $0x108] sm:$0xff] }
  0x1b   :  { %348 = vst.msk [vmem:[%s1576_s1 + $0xb8] sm:$0x7f] %vm325_vm2, %v298_v63  ;;  %v251_v18 = vsub.f32 %v956_v52, %v145_v13  ;;  %v148_v22 = vsel %vm106_vm0, %v146_v5, %v147_v4  ;;  %v150_v23 = vrot.slane %v1004_v17, 1  ;;  %397 = vrot.lane.b32.xlu0 %v801_v42, %s671_s15  ;;  %v149_v34 = vrot.slane %v1017_v24, 1  ;;  %v1060_v48 = vld [vmem:[%s1575_s0 + $0x100] sm:$0xff]  ;;  %v1076_v58 = vld [vmem:[%s1575_s0 + $0x118] sm:$0xff] }
  0x1c   :  { %345 = vst.msk [vmem:[%s1576_s1 + $0xa0] sm:$0xff] %vm323_vm1, %v295_v8  ;;  %v297_v29 = vand.u32 2147483647, %v249_v9  ;;  %v300_v31 = vand.u32 2147483647, %v252_v12  ;;  %v253_v32 = vsub.f32 %v985_v61, %v148_v22  ;;  %v153_v40 = vrot.slane %v1022_v25, 1 }
  0x1d   :  { %v299_v37 = vand.u32 2147483647, %v251_v18  ;;  %v302_v38 = vand.u32 2147483647, %v254_v19  ;;  %v256_v39 = vsub.f32 %v1004_v17, %v150_v23  ;;  %v151_v45 = vsel %vm106_vm0, %v149_v34, %v150_v23  ;;  %v1081_v59 = vld [vmem:[%s1575_s0 + $0x110] sm:$0xff] }
  0x1e   :  { %347 = vst.msk [vmem:[%s1576_s1 + $0xb0] sm:$0xff] %vm323_vm1, %v297_v29  ;;  %v301_v44 = vand.u32 2147483647, %v253_v32  ;;  %v152_v46 = vrot.slane %v1037_v35, 1  ;;  %v156_v47 = vrot.slane %v1044_v43, 1  ;;  %v255_v50 = vsub.f32 %v1017_v24, %v151_v45  ;;  %403 = vrot.lane.b32.xlu1 %v833_v55, %s671_s15  ;;  %v1107_v29 = vld [vmem:[%s1575_s0 + $0x128] sm:$0xff] }
  0x1f   :  { %350 = vst.msk [vmem:[%s1576_s1 + $0xc8] sm:$0x7f] %vm325_vm2, %v300_v31  ;;  %352 = vst.msk [vmem:[%s1576_s1 + $0xd8] sm:$0x7f] %vm325_vm2, %v302_v38  ;;  %v304_v49 = vand.u32 2147483647, %v256_v39  ;;  %v258_v53 = vsub.f32 %v1022_v25, %v153_v40  ;;  %401 = vrot.lane.b32.xlu0 %v838_v56, %s671_s15 }
  0x20   :  { %349 = vst.msk [vmem:[%s1576_s1 + $0xc0] sm:$0xff] %vm323_vm1, %v299_v37  ;;  %v155_v54 = vrot.slane %v1060_v48, 1  ;;  %351 = vst.msk [vmem:[%s1576_s1 + $0xd0] sm:$0xff] %vm323_vm1, %v301_v44  ;;  %v154_v63 = vsel %vm106_vm0, %v152_v46, %v153_v40  ;;  %v260_v3 = vsub.f32 %v1044_v43, %v156_v47  ;;  %v159_v4 = vrot.slane %v1076_v58, 1  ;;  %v1112_v31 = vld [vmem:[%s1575_s0 + $0x120] sm:$0xff]  ;;  %v1117_v32 = vld [vmem:[%s1575_s0 + $0x138] sm:$0xff] }
  0x21   :  { %v158_v5 = vrot.slane %v1081_v59, 1  ;;  %354 = vst.msk [vmem:[%s1576_s1 + $0xe8] sm:$0x7f] %vm325_vm2, %v304_v49  ;;  %v303_v8 = vand.u32 2147483647, %v255_v50  ;;  %v257_v12 = vsub.f32 %v1037_v35, %v154_v63  ;;  %v162_v38 = vrot.slane %v1107_v29, 1 }
  0x22   :  { %v306_v9 = vand.u32 2147483647, %v258_v53  ;;  %v157_v13 = vsel %vm106_vm0, %v155_v54, %v156_v47  ;;  %v308_v18 = vand.u32 2147483647, %v260_v3  ;;  %v262_v22 = vsub.f32 %v1076_v58, %v159_v4  ;;  %v1133_v40 = vld [vmem:[%s1575_s0 + $0x130] sm:$0xff]  ;;  %v1138_v44 = vld [vmem:[%s1575_s0 + $0x148] sm:$0xff]  ;;  %407 = vrot.lane.b32.xlu1 %v843_v57, %s671_s15 }
  0x23   :  { %v259_v19 = vsub.f32 %v1060_v48, %v157_v13  ;;  %v160_v23 = vsel %vm106_vm0, %v158_v5, %v159_v4  ;;  %353 = vst.msk [vmem:[%s1576_s1 + $0xe0] sm:$0xff] %vm323_vm1, %v303_v8  ;;  %v305_v34 = vand.u32 2147483647, %v257_v12  ;;  %v161_v39 = vrot.slane %v1112_v31, 1  ;;  %405 = vrot.lane.b32.xlu0 %v850_v62, %s671_s15  ;;  %v1160_v3 = vld [vmem:[%s1575_s0 + $0x140] sm:$0xff]  ;;  %v1177_v12 = vld [vmem:[%s1575_s0 + $0x158] sm:$0xff] }
  0x24   :  { %356 = vst.msk [vmem:[%s1576_s1 + $0xf8] sm:$0x7f] %vm325_vm2, %v306_v9  ;;  %v261_v37 = vsub.f32 %v1081_v59, %v160_v23  ;;  %358 = vst.msk [vmem:[%s1576_s1 + $0x108] sm:$0x7f] %vm325_vm2, %v308_v18  ;;  %v310_v46 = vand.u32 2147483647, %v262_v22  ;;  %v264_v53 = vsub.f32 %v1107_v29, %v162_v38 }
  0x25   :  { %v307_v45 = vand.u32 2147483647, %v259_v19  ;;  %v165_v47 = vrot.slane %v1117_v32, 1  ;;  %v164_v49 = vrot.slane %v1133_v40, 1  ;;  %355 = vst.msk [vmem:[%s1576_s1 + $0xf0] sm:$0xff] %vm323_vm1, %v305_v34  ;;  %v163_v54 = vsel %vm106_vm0, %v161_v39, %v162_v38  ;;  %v1189_v23 = vld [vmem:[%s1575_s0 + $0x150] sm:$0xff] }
  0x26   :  { %v309_v50 = vand.u32 2147483647, %v261_v37  ;;  %v168_v63 = vrot.slane %v1138_v44, 1  ;;  %360 = vst.msk [vmem:[%s1576_s1 + $0x118] sm:$0x7f] %vm325_vm2, %v310_v46  ;;  %v263_v4 = vsub.f32 %v1112_v31, %v163_v54  ;;  %v167_v9 = vrot.slane %v1160_v3, 1  ;;  %411 = vrot.lane.b32.xlu1 %v876_v14, %s671_s15 }
  0x27   :  { %357 = vst.msk [vmem:[%s1576_s1 + $0x100] sm:$0xff] %vm323_vm1, %v307_v45  ;;  %v266_v5 = vsub.f32 %v1117_v32, %v165_v47  ;;  %v166_v8 = vsel %vm106_vm0, %v164_v49, %v165_v47  ;;  %v312_v13 = vand.u32 2147483647, %v264_v53  ;;  %v171_v22 = vrot.slane %v1177_v12, 1  ;;  %409 = vrot.lane.b32.xlu0 %v881_v15, %s671_s15  ;;  %v1200_v45 = vld [vmem:[%s1575_s0 + $0x168] sm:$0xff]  ;;  %v1211_v53 = vld [vmem:[%s1575_s0 + $0x160] sm:$0xff] }
  0x28   :  { %359 = vst.msk [vmem:[%s1576_s1 + $0x110] sm:$0xff] %vm323_vm1, %v309_v50  ;;  %v265_v18 = vsub.f32 %v1133_v40, %v166_v8  ;;  %v268_v19 = vsub.f32 %v1138_v44, %v168_v63  ;;  %v311_v34 = vand.u32 2147483647, %v263_v4  ;;  %v169_v38 = vsel %vm106_vm0, %v167_v9, %v168_v63  ;;  %v1216_v54 = vld [vmem:[%s1575_s0 + $0x178] sm:$0xff]  ;;  %v1233_v9 = vld [vmem:[%s1575_s0 + $0x170] sm:$0xff] }
  0x29   :  { %v314_v37 = vand.u32 2147483647, %v266_v5  ;;  %v170_v39 = vrot.slane %v1189_v23, 1  ;;  %362 = vst.msk [vmem:[%s1576_s1 + $0x128] sm:$0x7f] %vm325_vm2, %v312_v13  ;;  %v267_v49 = vsub.f32 %v1160_v3, %v169_v38  ;;  %v270_v50 = vsub.f32 %v1177_v12, %v171_v22 }
  0x2a   :  { %v313_v46 = vand.u32 2147483647, %v265_v18  ;;  %v316_v47 = vand.u32 2147483647, %v268_v19  ;;  %361 = vst.msk [vmem:[%s1576_s1 + $0x120] sm:$0xff] %vm323_vm1, %v311_v34  ;;  %v174_v4 = vrot.slane %v1200_v45, 1  ;;  %415 = vrot.lane.b32.xlu1 %v886_v16, %s671_s15 }
  0x2b   :  { %364 = vst.msk [vmem:[%s1576_s1 + $0x138] sm:$0x7f] %vm325_vm2, %v314_v37  ;;  %v172_v63 = vsel %vm106_vm0, %v170_v39, %v171_v22  ;;  %v173_v5 = vrot.slane %v1211_v53, 1  ;;  %v177_v8 = vrot.slane %v1216_v54, 1  ;;  %v315_v13 = vand.u32 2147483647, %v267_v49  ;;  %413 = vrot.lane.b32.xlu0 %v909_v30, %s671_s15 }
  0x2c   :  { %363 = vst.msk [vmem:[%s1576_s1 + $0x130] sm:$0xff] %vm323_vm1, %v313_v46  ;;  %v318_v18 = vand.u32 2147483647, %v270_v50  ;;  %v269_v19 = vsub.f32 %v1189_v23, %v172_v63  ;;  %v176_v22 = vrot.slane %v1233_v9, 1  ;;  %v272_v34 = vsub.f32 %v1200_v45, %v174_v4 }
  0x2d   :  { %366 = vst.msk [vmem:[%s1576_s1 + $0x148] sm:$0x7f] %vm325_vm2, %v316_v47  ;;  %v175_v37 = vsel %vm106_vm0, %v173_v5, %v174_v4  ;;  %v274_v38 = vsub.f32 %v1216_v54, %v177_v8 }
  0x2e   :  { %365 = vst.msk [vmem:[%s1576_s1 + $0x140] sm:$0xff] %vm323_vm1, %v315_v13  ;;  %v317_v39 = vand.u32 2147483647, %v269_v19  ;;  %v271_v46 = vsub.f32 %v1211_v53, %v175_v37  ;;  %v178_v47 = vsel %vm106_vm0, %v176_v22, %v177_v8  ;;  %v320_v49 = vand.u32 2147483647, %v272_v34  ;;  %419 = vrot.lane.b32.xlu1 %v926_v36, %s671_s15 }
  0x2f   :  { %368 = vst.msk [vmem:[%s1576_s1 + $0x158] sm:$0x7f] %vm325_vm2, %v318_v18  ;;  %v322_v50 = vand.u32 2147483647, %v274_v38  ;;  %v273_v63 = vsub.f32 %v1233_v9, %v178_v47  ;;  %417 = vrot.lane.b32.xlu0 %v938_v41, %s671_s15 }
  0x30   :  { %367 = vst.msk [vmem:[%s1576_s1 + $0x150] sm:$0xff] %vm323_vm1, %v317_v39  ;;  %v319_v4 = vand.u32 2147483647, %v271_v46 }
  0x31   :  { %370 = vst.msk [vmem:[%s1576_s1 + $0x168] sm:$0x7f] %vm325_vm2, %v320_v49  ;;  %372 = vst.msk [vmem:[%s1576_s1 + $0x178] sm:$0x7f] %vm325_vm2, %v322_v50  ;;  %v321_v5 = vand.u32 2147483647, %v273_v63 }
  0x32   :  { %369 = vst.msk [vmem:[%s1576_s1 + $0x160] sm:$0xff] %vm323_vm1, %v319_v4  ;;  %423 = vrot.lane.b32.xlu1 %v951_v51, %s671_s15 }
  0x33   :  { %371 = vst.msk [vmem:[%s1576_s1 + $0x170] sm:$0xff] %vm323_vm1, %v321_v5  ;;  %421 = vrot.lane.b32.xlu0 %v956_v52, %s671_s15 }
  0x36   :  { %427 = vrot.lane.b32.xlu1 %v980_v60, %s671_s15 }
  0x37   :  { %425 = vrot.lane.b32.xlu0 %v985_v61, %s671_s15 }
  0x3a   :  { %431 = vrot.lane.b32.xlu1 %v1004_v17, %s671_s15 }
  0x3b   :  { %429 = vrot.lane.b32.xlu0 %v1017_v24, %s671_s15 }
  0x3e   :  { %435 = vrot.lane.b32.xlu1 %v1022_v25, %s671_s15 }
  0x3f   :  { %433 = vrot.lane.b32.xlu0 %v1037_v35, %s671_s15 }
  0x42   :  { %439 = vrot.lane.b32.xlu1 %v1044_v43, %s671_s15 }
  0x43   :  { %437 = vrot.lane.b32.xlu0 %v1060_v48, %s671_s15 }
  0x46   :  { %443 = vrot.lane.b32.xlu1 %v1076_v58, %s671_s15 }
  0x47   :  { %441 = vrot.lane.b32.xlu0 %v1081_v59, %s671_s15 }
  0x4a   :  { %447 = vrot.lane.b32.xlu1 %v1107_v29, %s671_s15 }
  0x4b   :  { %445 = vrot.lane.b32.xlu0 %v1112_v31, %s671_s15 }
  0x4e   :  { %451 = vrot.lane.b32.xlu1 %v1117_v32, %s671_s15 }
  0x4f   :  { %449 = vrot.lane.b32.xlu0 %v1133_v40, %s671_s15 }
  0x52   :  { %455 = vrot.lane.b32.xlu1 %v1138_v44, %s671_s15 }
  0x53   :  { %453 = vrot.lane.b32.xlu0 %v1160_v3, %s671_s15 }
  0x56   :  { %459 = vrot.lane.b32.xlu1 %v1177_v12, %s671_s15 }
  0x57   :  { %457 = vrot.lane.b32.xlu0 %v1189_v23, %s671_s15 }
  0x5a   :  { %463 = vrot.lane.b32.xlu1 %v1200_v45, %s671_s15 }
  0x5b   :  { %461 = vrot.lane.b32.xlu0 %v1211_v53, %s671_s15 }
  0x5e   :  { %467 = vrot.lane.b32.xlu1 %v1216_v54, %s671_s15 }
  0x5f   :  { %465 = vrot.lane.b32.xlu0 %v1233_v9, %s671_s15 }
  0x74   :  { %v378_v8 = vpop.permute.xlu1 %377  ;;  %v374_v13 = vpop.permute.xlu0 %373 }
  0x75   :  { %v519_v18 = vsub.f32 %v690_v0, %v378_v8  ;;  %v517_v19 = vsub.f32 %v695_v1, %v374_v13 }
  0x77   :  { %v567_v22 = vand.u32 2147483647, %v519_v18  ;;  %v565_v34 = vand.u32 2147483647, %v517_v19 }
  0x78   :  { %v380_v37 = vpop.permute.xlu1 %379  ;;  %v376_v38 = vpop.permute.xlu0 %375 }
  0x79   :  { %616 = vst.msk [vmem:[%s1577_s2 + $0x10] sm:$0xff] %vm613_vm3, %v567_v22  ;;  %614 = vst.msk [vmem:[%s1577_s2] sm:$0xff] %vm613_vm3, %v565_v34  ;;  %v520_v39 = vsub.f32 %v700_v2, %v380_v37  ;;  %v518_v0 = vsub.f32 %v712_v6, %v376_v38 }
  0x7b   :  { %v568_v1 = vand.u32 2147483647, %v520_v39  ;;  %v566_v46 = vand.u32 2147483647, %v518_v0 }
  0x7c   :  { %v384_v47 = vpop.permute.xlu1 %383  ;;  %v382_v49 = vpop.permute.xlu0 %381 }
  0x7d   :  { %617 = vst.msk [vmem:[%s1577_s2 + $0x18] sm:$0xff] %vm613_vm3, %v568_v1  ;;  %615 = vst.msk [vmem:[%s1577_s2 + $0x8] sm:$0xff] %vm613_vm3, %v566_v46  ;;  %v522_v50 = vsub.f32 %v717_v7, %v384_v47  ;;  %v521_v2 = vsub.f32 %v724_v10, %v382_v49 }
  0x7f   :  { %v570_v63 = vand.u32 2147483647, %v522_v50  ;;  %v569_v6 = vand.u32 2147483647, %v521_v2 }
  0x80   :  { %v388_v4 = vpop.permute.xlu1 %387  ;;  %v386_v5 = vpop.permute.xlu0 %385 }
  0x81   :  { %619 = vst.msk [vmem:[%s1577_s2 + $0x28] sm:$0xff] %vm613_vm3, %v570_v63  ;;  %618 = vst.msk [vmem:[%s1577_s2 + $0x20] sm:$0xff] %vm613_vm3, %v569_v6  ;;  %v524_v8 = vsub.f32 %v729_v11, %v388_v4  ;;  %v523_v7 = vsub.f32 %v742_v20, %v386_v5 }
  0x83   :  { %v572_v13 = vand.u32 2147483647, %v524_v8  ;;  %v571_v10 = vand.u32 2147483647, %v523_v7 }
  0x84   :  { %v392_v18 = vpop.permute.xlu1 %391  ;;  %v390_v19 = vpop.permute.xlu0 %389 }
  0x85   :  { %621 = vst.msk [vmem:[%s1577_s2 + $0x38] sm:$0xff] %vm613_vm3, %v572_v13  ;;  %620 = vst.msk [vmem:[%s1577_s2 + $0x30] sm:$0xff] %vm613_vm3, %v571_v10  ;;  %v526_v22 = vsub.f32 %v747_v21, %v392_v18  ;;  %v525_v11 = vsub.f32 %v759_v26, %v390_v19 }
  0x87   :  { %v574_v34 = vand.u32 2147483647, %v526_v22  ;;  %v573_v20 = vand.u32 2147483647, %v525_v11 }
  0x88   :  { %v396_v37 = vpop.permute.xlu1 %395  ;;  %v394_v38 = vpop.permute.xlu0 %393 }
  0x89   :  { %623 = vst.msk [vmem:[%s1577_s2 + $0x48] sm:$0xff] %vm613_vm3, %v574_v34  ;;  %622 = vst.msk [vmem:[%s1577_s2 + $0x40] sm:$0xff] %vm613_vm3, %v573_v20  ;;  %v528_v39 = vsub.f32 %v764_v27, %v396_v37  ;;  %v527_v21 = vsub.f32 %v769_v28, %v394_v38 }
  0x8b   :  { %v576_v0 = vand.u32 2147483647, %v528_v39  ;;  %v575_v26 = vand.u32 2147483647, %v527_v21 }
  0x8c   :  { %v400_v1 = vpop.permute.xlu1 %399 }
  0x8d   :  { %v398_v46 = vpop.permute.xlu0 %397  ;;  %625 = vst.msk [vmem:[%s1577_s2 + $0x58] sm:$0xff] %vm613_vm3, %v576_v0  ;;  %624 = vst.msk [vmem:[%s1577_s2 + $0x50] sm:$0xff] %vm613_vm3, %v575_v26  ;;  %v530_v47 = vsub.f32 %v775_v33, %v400_v1 }
  0x8e   :  { %v529_v27 = vsub.f32 %v801_v42, %v398_v46 }
  0x8f   :  { %v578_v49 = vand.u32 2147483647, %v530_v47 }
  0x90   :  { %v577_v28 = vand.u32 2147483647, %v529_v27  ;;  %v404_v50 = vpop.permute.xlu1 %403 }
  0x91   :  { %v402_v2 = vpop.permute.xlu0 %401  ;;  %627 = vst.msk [vmem:[%s1577_s2 + $0x68] sm:$0xff] %vm613_vm3, %v578_v49  ;;  %v532_v63 = vsub.f32 %v833_v55, %v404_v50 }
  0x92   :  { %626 = vst.msk [vmem:[%s1577_s2 + $0x60] sm:$0xff] %vm613_vm3, %v577_v28  ;;  %v531_v33 = vsub.f32 %v838_v56, %v402_v2 }
  0x93   :  { %v580_v6 = vand.u32 2147483647, %v532_v63 }
  0x94   :  { %v579_v42 = vand.u32 2147483647, %v531_v33  ;;  %v408_v4 = vpop.permute.xlu1 %407 }
  0x95   :  { %v406_v5 = vpop.permute.xlu0 %405  ;;  %629 = vst.msk [vmem:[%s1577_s2 + $0x78] sm:$0xff] %vm613_vm3, %v580_v6  ;;  %v534_v8 = vsub.f32 %v843_v57, %v408_v4 }
  0x96   :  { %628 = vst.msk [vmem:[%s1577_s2 + $0x70] sm:$0xff] %vm613_vm3, %v579_v42  ;;  %v533_v55 = vsub.f32 %v850_v62, %v406_v5 }
  0x97   :  { %v582_v7 = vand.u32 2147483647, %v534_v8 }
  0x98   :  { %v581_v56 = vand.u32 2147483647, %v533_v55  ;;  %v412_v13 = vpop.permute.xlu1 %411 }
  0x99   :  { %v410_v10 = vpop.permute.xlu0 %409  ;;  %631 = vst.msk [vmem:[%s1577_s2 + $0x88] sm:$0xff] %vm613_vm3, %v582_v7  ;;  %v536_v18 = vsub.f32 %v876_v14, %v412_v13 }
  0x9a   :  { %630 = vst.msk [vmem:[%s1577_s2 + $0x80] sm:$0xff] %vm613_vm3, %v581_v56  ;;  %v535_v57 = vsub.f32 %v881_v15, %v410_v10 }
  0x9b   :  { %v584_v19 = vand.u32 2147483647, %v536_v18 }
  0x9c   :  { %v583_v62 = vand.u32 2147483647, %v535_v57  ;;  %v416_v22 = vpop.permute.xlu1 %415 }
  0x9d   :  { %v414_v11 = vpop.permute.xlu0 %413  ;;  %633 = vst.msk [vmem:[%s1577_s2 + $0x98] sm:$0xff] %vm613_vm3, %v584_v19  ;;  %v538_v34 = vsub.f32 %v886_v16, %v416_v22 }
  0x9e   :  { %632 = vst.msk [vmem:[%s1577_s2 + $0x90] sm:$0xff] %vm613_vm3, %v583_v62  ;;  %v537_v14 = vsub.f32 %v909_v30, %v414_v11 }
  0x9f   :  { %v586_v20 = vand.u32 2147483647, %v538_v34 }
  0xa0   :  { %v585_v15 = vand.u32 2147483647, %v537_v14  ;;  %v420_v37 = vpop.permute.xlu1 %419 }
  0xa1   :  { %v418_v38 = vpop.permute.xlu0 %417  ;;  %635 = vst.msk [vmem:[%s1577_s2 + $0xa8] sm:$0xff] %vm613_vm3, %v586_v20  ;;  %v540_v39 = vsub.f32 %v926_v36, %v420_v37 }
  0xa2   :  { %634 = vst.msk [vmem:[%s1577_s2 + $0xa0] sm:$0xff] %vm613_vm3, %v585_v15  ;;  %v539_v16 = vsub.f32 %v938_v41, %v418_v38 }
  0xa3   :  { %v588_v21 = vand.u32 2147483647, %v540_v39 }
  0xa4   :  { %v587_v30 = vand.u32 2147483647, %v539_v16  ;;  %v424_v0 = vpop.permute.xlu1 %423 }
  0xa5   :  { %v422_v26 = vpop.permute.xlu0 %421  ;;  %637 = vst.msk [vmem:[%s1577_s2 + $0xb8] sm:$0xff] %vm613_vm3, %v588_v21  ;;  %v542_v1 = vsub.f32 %v951_v51, %v424_v0 }
  0xa6   :  { %636 = vst.msk [vmem:[%s1577_s2 + $0xb0] sm:$0xff] %vm613_vm3, %v587_v30  ;;  %v541_v36 = vsub.f32 %v956_v52, %v422_v26 }
  0xa7   :  { %v590_v46 = vand.u32 2147483647, %v542_v1 }
  0xa8   :  { %v589_v41 = vand.u32 2147483647, %v541_v36  ;;  %v428_v47 = vpop.permute.xlu1 %427 }
  0xa9   :  { %v426_v27 = vpop.permute.xlu0 %425  ;;  %639 = vst.msk [vmem:[%s1577_s2 + $0xc8] sm:$0xff] %vm613_vm3, %v590_v46  ;;  %v544_v49 = vsub.f32 %v980_v60, %v428_v47 }
  0xaa   :  { %638 = vst.msk [vmem:[%s1577_s2 + $0xc0] sm:$0xff] %vm613_vm3, %v589_v41  ;;  %v543_v51 = vsub.f32 %v985_v61, %v426_v27 }
  0xab   :  { %v592_v28 = vand.u32 2147483647, %v544_v49 }
  0xac   :  { %v591_v52 = vand.u32 2147483647, %v543_v51  ;;  %v432_v50 = vpop.permute.xlu1 %431 }
  0xad   :  { %v430_v2 = vpop.permute.xlu0 %429  ;;  %641 = vst.msk [vmem:[%s1577_s2 + $0xd8] sm:$0xff] %vm613_vm3, %v592_v28  ;;  %v546_v63 = vsub.f32 %v1004_v17, %v432_v50 }
  0xae   :  { %640 = vst.msk [vmem:[%s1577_s2 + $0xd0] sm:$0xff] %vm613_vm3, %v591_v52  ;;  %v545_v60 = vsub.f32 %v1017_v24, %v430_v2 }
  0xaf   :  { %v594_v33 = vand.u32 2147483647, %v546_v63 }
  0xb0   :  { %v593_v61 = vand.u32 2147483647, %v545_v60  ;;  %v436_v6 = vpop.permute.xlu1 %435 }
  0xb1   :  { %v434_v42 = vpop.permute.xlu0 %433  ;;  %643 = vst.msk [vmem:[%s1577_s2 + $0xe8] sm:$0xff] %vm613_vm3, %v594_v33  ;;  %v548_v4 = vsub.f32 %v1022_v25, %v436_v6 }
  0xb2   :  { %642 = vst.msk [vmem:[%s1577_s2 + $0xe0] sm:$0xff] %vm613_vm3, %v593_v61  ;;  %v547_v17 = vsub.f32 %v1037_v35, %v434_v42 }
  0xb3   :  { %v596_v5 = vand.u32 2147483647, %v548_v4 }
  0xb4   :  { %v595_v24 = vand.u32 2147483647, %v547_v17  ;;  %v440_v8 = vpop.permute.xlu1 %439 }
  0xb5   :  { %v438_v55 = vpop.permute.xlu0 %437  ;;  %645 = vst.msk [vmem:[%s1577_s2 + $0xf8] sm:$0xff] %vm613_vm3, %v596_v5  ;;  %v550_v7 = vsub.f32 %v1044_v43, %v440_v8 }
  0xb6   :  { %644 = vst.msk [vmem:[%s1577_s2 + $0xf0] sm:$0xff] %vm613_vm3, %v595_v24  ;;  %v549_v25 = vsub.f32 %v1060_v48, %v438_v55 }
  0xb7   :  { %v598_v56 = vand.u32 2147483647, %v550_v7 }
  0xb8   :  { %v597_v35 = vand.u32 2147483647, %v549_v25  ;;  %v444_v13 = vpop.permute.xlu1 %443 }
  0xb9   :  { %v442_v10 = vpop.permute.xlu0 %441  ;;  %647 = vst.msk [vmem:[%s1577_s2 + $0x108] sm:$0xff] %vm613_vm3, %v598_v56  ;;  %v552_v18 = vsub.f32 %v1076_v58, %v444_v13 }
  0xba   :  { %646 = vst.msk [vmem:[%s1577_s2 + $0x100] sm:$0xff] %vm613_vm3, %v597_v35  ;;  %v551_v43 = vsub.f32 %v1081_v59, %v442_v10 }
  0xbb   :  { %v600_v57 = vand.u32 2147483647, %v552_v18 }
  0xbc   :  { %v599_v48 = vand.u32 2147483647, %v551_v43  ;;  %v448_v19 = vpop.permute.xlu1 %447 }
  0xbd   :  { %v446_v62 = vpop.permute.xlu0 %445  ;;  %649 = vst.msk [vmem:[%s1577_s2 + $0x118] sm:$0xff] %vm613_vm3, %v600_v57  ;;  %v554_v22 = vsub.f32 %v1107_v29, %v448_v19 }
  0xbe   :  { %648 = vst.msk [vmem:[%s1577_s2 + $0x110] sm:$0xff] %vm613_vm3, %v599_v48  ;;  %v553_v58 = vsub.f32 %v1112_v31, %v446_v62 }
  0xbf   :  { %v602_v11 = vand.u32 2147483647, %v554_v22 }
  0xc0   :  { %v601_v59 = vand.u32 2147483647, %v553_v58  ;;  %v452_v34 = vpop.permute.xlu1 %451 }
  0xc1   :  { %v450_v14 = vpop.permute.xlu0 %449  ;;  %651 = vst.msk [vmem:[%s1577_s2 + $0x128] sm:$0xff] %vm613_vm3, %v602_v11  ;;  %v556_v20 = vsub.f32 %v1117_v32, %v452_v34 }
  0xc2   :  { %650 = vst.msk [vmem:[%s1577_s2 + $0x120] sm:$0xff] %vm613_vm3, %v601_v59  ;;  %v555_v29 = vsub.f32 %v1133_v40, %v450_v14 }
  0xc3   :  { %v604_v15 = vand.u32 2147483647, %v556_v20 }
  0xc4   :  { %v603_v31 = vand.u32 2147483647, %v555_v29  ;;  %v456_v37 = vpop.permute.xlu1 %455 }
  0xc5   :  { %v454_v38 = vpop.permute.xlu0 %453  ;;  %653 = vst.msk [vmem:[%s1577_s2 + $0x138] sm:$0xff] %vm613_vm3, %v604_v15  ;;  %v558_v39 = vsub.f32 %v1138_v44, %v456_v37 }
  0xc6   :  { %652 = vst.msk [vmem:[%s1577_s2 + $0x130] sm:$0xff] %vm613_vm3, %v603_v31  ;;  %v557_v32 = vsub.f32 %v1160_v3, %v454_v38 }
  0xc7   :  { %v606_v16 = vand.u32 2147483647, %v558_v39 }
  0xc8   :  { %v605_v40 = vand.u32 2147483647, %v557_v32  ;;  %v460_v21 = vpop.permute.xlu1 %459 }
  0xc9   :  { %v458_v30 = vpop.permute.xlu0 %457  ;;  %655 = vst.msk [vmem:[%s1577_s2 + $0x148] sm:$0xff] %vm613_vm3, %v606_v16  ;;  %v560_v0 = vsub.f32 %v1177_v12, %v460_v21 }
  0xca   :  { %654 = vst.msk [vmem:[%s1577_s2 + $0x140] sm:$0xff] %vm613_vm3, %v605_v40  ;;  %v559_v44 = vsub.f32 %v1189_v23, %v458_v30 }
  0xcb   :  { %v608_v26 = vand.u32 2147483647, %v560_v0 }
  0xcc   :  { %v607_v3 = vand.u32 2147483647, %v559_v44  ;;  %v464_v1 = vpop.permute.xlu1 %463 }
  0xcd   :  { %v462_v36 = vpop.permute.xlu0 %461  ;;  %657 = vst.msk [vmem:[%s1577_s2 + $0x158] sm:$0xff] %vm613_vm3, %v608_v26  ;;  %v562_v46 = vsub.f32 %v1200_v45, %v464_v1 }
  0xce   :  { %656 = vst.msk [vmem:[%s1577_s2 + $0x150] sm:$0xff] %vm613_vm3, %v607_v3  ;;  %v561_v12 = vsub.f32 %v1211_v53, %v462_v36 }
  0xcf   :  { %v610_v41 = vand.u32 2147483647, %v562_v46 }
  0xd0   :  { %v609_v23 = vand.u32 2147483647, %v561_v12  ;;  %v468_v47 = vpop.permute.xlu1 %467 }
  0xd1   :  { %v466_v27 = vpop.permute.xlu0 %465  ;;  %659 = vst.msk [vmem:[%s1577_s2 + $0x168] sm:$0xff] %vm613_vm3, %v610_v41  ;;  %v564_v49 = vsub.f32 %v1216_v54, %v468_v47 }
  0xd2   :  { %658 = vst.msk [vmem:[%s1577_s2 + $0x160] sm:$0xff] %vm613_vm3, %v609_v23  ;;  %v563_v45 = vsub.f32 %v1233_v9, %v466_v27 }
  0xd3   :  { %v612_v51 = vand.u32 2147483647, %v564_v49 }
  0xd4   :  { %v611_v53 = vand.u32 2147483647, %v563_v45 }
  0xd5   :  { %661 = vst.msk [vmem:[%s1577_s2 + $0x178] sm:$0xff] %vm613_vm3, %v612_v51 }
  0xd6   :  { %660 = vst.msk [vmem:[%s1577_s2 + $0x170] sm:$0xff] %vm613_vm3, %v611_v53 }

</bundles_post_ra>
